<compile_context>
chip_gen: v5e
topology: v5e:2x2
jax: 0.10.0
libtpu: 0.0.40
codegen_flags: <defaults>
</compile_context>

<pallas_src>
import functools

import jax
import jax.numpy as jnp
from jax.experimental import pallas as pl
from jax.experimental.pallas import tpu as pltpu


def _round_up(x, m):
    return (x + m - 1) // m * m


def _tpu_generation():
    """Best-effort TPU generation detection; falls back to conservative."""
    try:
        kind = jax.devices()[0].device_kind.lower()
    except Exception:
        return "unknown"
    if "v7" in kind:
        return "v7x"
    if "v6" in kind or "trillium" in kind:
        return "v6e"
    if "v5 lite" in kind or "v5e" in kind or "v5litepod" in kind:
        return "v5e"
    return "unknown"


# generation -> (tq_max, per-step VMEM budget for blocks+temps, vmem_limit cap)
_GEN_PARAMS = {
    "v7x":     (256, 36 << 20, 48 << 20),    # 64 MiB physical VMEM per TC
    "v6e":     (256, 80 << 20, 100 << 20),   # 128 MiB physical, 2x256 MXU
    "v5e":     (128, 80 << 20, 100 << 20),   # 128 MiB physical, 4x128 MXU
    "unknown": (256, 20 << 20, 32 << 20),    # safe everywhere
}


def _attention_kernel(inp_ref, tw_ref, ctx_ref, aw_ref, *, s_in_valid):
    # inp_ref: (1, S_in_p, D_in_p)  tw_ref: (1, TQ, D_in_p)   (compute dtype)
    inp = inp_ref[0]                       # (S_in_p, D_in_p)
    tw = tw_ref[0]                         # (TQ,     D_in_p)

    # scores (TQ, S_in_p): contract the feature axis directly (no transpose),
    # bf16 (or f32) operands with f32 accumulation on the MXU.
    scores = jax.lax.dot_general(
        tw, inp,
        dimension_numbers=(((1,), (1,)), ((), ())),
        preferred_element_type=jnp.float32)

    s_in_pad = scores.shape[-1]
    if s_in_valid != s_in_pad:
        # (1, S_in_p) iota -> additive bias broadcast over the TQ rows
        # (avoids a full (TQ, S_in_p) iota + compare every grid step).
        col = jax.lax.broadcasted_iota(jnp.int32, (1, s_in_pad), 1)
        bias = jnp.where(col < s_in_valid, 0.0, -1e30).astype(jnp.float32)
        scores = scores + bias

    # softmax over the input-sequence axis, kept in f32. Exact divide: the
    # denominator is only (TQ, 1), so exact normalization is essentially free
    # and rows sum to 1 at f32 precision (matches torch.softmax behaviour).
    m = jnp.max(scores, axis=-1, keepdims=True)
    e = jnp.exp(scores - m)
    denom = jnp.sum(e, axis=-1, keepdims=True)
    weights = e / denom                                        # (TQ, S_in_p)

    # context (TQ, D_in_p) = weights @ inputs, f32 accumulation on the MXU.
    ctx = jax.lax.dot_general(
        weights.astype(inp.dtype), inp,
        dimension_numbers=(((1,), (0,)), ((), ())),
        preferred_element_type=jnp.float32)

    ctx_ref[0] = ctx.astype(ctx_ref.dtype)
    aw_ref[0] = weights.astype(aw_ref.dtype)


def attention_forward(inputs, targets, w, *,
                      compute_dtype=jnp.bfloat16,
                      weights_dtype=jnp.float32):
    """Bilinear-score attention forward.

    inputs:  (B, S_in, D_in) float32
    targets: (B, S_t,  D_t)  float32
    w:       (D_t, D_in)     float32

    Returns (context (B, S_t, D_in) in inputs.dtype,
             attention_weights (B, S_t, S_in) in `weights_dtype`).

    compute_dtype=bfloat16 (default) runs the MXU contractions with bf16
    operands and f32 accumulation (~1e-2 relative deviation from an all-f32
    reference). Pass compute_dtype=float32 for f32-operand matmuls at ~3x MXU
    cost. The softmax itself is always f32.
    """
    B, S_in, D_in = inputs.shape
    Bt, S_t, D_t = targets.shape
    assert B == Bt and w.shape == (D_t, D_in)

    gen = _tpu_generation()
    tq_max, budget, vmem_cap = _GEN_PARAMS[gen]

    cbytes = jnp.dtype(compute_dtype).itemsize
    obytes = jnp.dtype(inputs.dtype).itemsize
    wbytes = jnp.dtype(weights_dtype).itemsize

    # Lane-dense padding: key axis and feature axis to multiples of 128
    # (unmasked vst for both the attention-weights and context writebacks,
    # full MXU lanes on both contractions).
    S_in_p = _round_up(S_in, 128)
    D_in_p = _round_up(D_in, 128)

    # Per-step VMEM model: double-buffered pipelined blocks plus the kernel
    # body temporaries (scores / e / weights in f32 + the compute-dtype copy
    # of weights for the second matmul).
    def _vmem_bytes(tq):
        blocks = 2 * (S_in_p * D_in_p * cbytes          # inputs block
                      + tq * D_in_p * cbytes            # tw block
                      + tq * D_in_p * obytes            # context out block
                      + tq * S_in_p * wbytes)           # attn-weights out block
        temps = tq * S_in_p * (3 * 4 + cbytes)
        return blocks + temps

    if S_t <= tq_max and _vmem_bytes(S_t) <= budget:
        TQ = S_t                           # single full-extent tile is legal
    else:
        TQ = tq_max
        while TQ > 8 and _vmem_bytes(TQ) > budget:
            TQ //= 2
    S_t_p = _round_up(S_t, TQ)
    n_q = S_t_p // TQ

    # Guarantee >= 2 grid steps so both TensorCores (v7x megacore) get work.
    if B * n_q < 2 and TQ > 8:
        TQ = _round_up(max(8, TQ // 2), 8)
        S_t_p = _round_up(S_t, TQ)
        n_q = S_t_p // TQ

    # Hoist targets @ W to one full-size XLA GEMM (per-tile K=D_t matmuls are
    # MXU-starved when D_t is small); the kernel never sees W.
    tw = jnp.einsum(
        "btd,de->bte",
        targets.astype(compute_dtype), w.astype(compute_dtype),
        preferred_element_type=jnp.float32).astype(compute_dtype)

    # Cast + pad ONCE in the wrapper: compute-dtype copies live in HBM, so the
    # per-step DMA and the double-buffered VMEM footprint are halved for bf16.
    inputs_p = jnp.pad(inputs.astype(compute_dtype),
                       ((0, 0), (0, S_in_p - S_in), (0, D_in_p - D_in)))
    tw_p = jnp.pad(tw, ((0, 0), (0, S_t_p - S_t), (0, D_in_p - D_in)))

    kernel = functools.partial(_attention_kernel, s_in_valid=S_in)

    flops = 4 * B * S_t_p * S_in_p * D_in_p            # two MXU contractions
    bytes_accessed = (cbytes * B * (S_in_p + S_t_p) * D_in_p   # inputs + tw
                      + obytes * B * S_t_p * D_in_p            # context
                      + wbytes * B * S_t_p * S_in_p)           # attn weights
    cost = pl.CostEstimate(flops=flops,
                           transcendentals=B * S_t_p * S_in_p,
                           bytes_accessed=bytes_accessed)

    vmem_limit = int(min(vmem_cap, max(32 << 20, _vmem_bytes(TQ) + (8 << 20))))

    grid_spec = pltpu.PrefetchScalarGridSpec(
        num_scalar_prefetch=0,
        grid=(B, n_q),
        in_specs=[
            pl.BlockSpec((1, S_in_p, D_in_p), lambda b, q: (b, 0, 0)),
            pl.BlockSpec((1, TQ, D_in_p), lambda b, q: (b, q, 0)),
        ],
        out_specs=[
            pl.BlockSpec((1, TQ, D_in_p), lambda b, q: (b, q, 0)),
            pl.BlockSpec((1, TQ, S_in_p), lambda b, q: (b, q, 0)),
        ],
    )

    ctx_p, aw_p = pl.pallas_call(
        kernel,
        out_shape=(
            jax.ShapeDtypeStruct((B, S_t_p, D_in_p), inputs.dtype),   # context
            jax.ShapeDtypeStruct((B, S_t_p, S_in_p), weights_dtype),  # weights
        ),
        grid_spec=grid_spec,
        compiler_params=pltpu.CompilerParams(
            dimension_semantics=("parallel", "parallel"),
            vmem_limit_bytes=vmem_limit),
        cost_estimate=cost,
    )(inputs_p, tw_p)

    return ctx_p[:, :S_t, :D_in], aw_p[:, :S_t, :S_in]


def _reference(inputs, targets, w):
    """f32 reference (matches the PyTorch module's math)."""
    scores = jnp.einsum("btd,de,bse->bts", targets, w, inputs)
    weights = jax.nn.softmax(scores, axis=-1)
    ctx = jnp.einsum("bts,bsd->btd", weights, inputs)
    return ctx, weights


def _reference_matched(inputs, targets, w, compute_dtype):
    """Reference using the kernel's precision policy (bf16 operands, f32 acc)."""
    f32 = jnp.float32
    tw = jnp.einsum("btd,de->bte", targets.astype(compute_dtype),
                    w.astype(compute_dtype), preferred_element_type=f32)
    scores = jnp.einsum("bte,bse->bts", tw.astype(compute_dtype),
                        inputs.astype(compute_dtype), preferred_element_type=f32)
    weights = jax.nn.softmax(scores, axis=-1)
    ctx = jnp.einsum("bts,bsd->btd", weights.astype(compute_dtype),
                     inputs.astype(compute_dtype), preferred_element_type=f32)
    return ctx, weights


if __name__ == "__main__":
    B, S_in, S_t, D_in, D_t = 2, 8, 8, 32, 32

    key = jax.random.PRNGKey(0)
    k_in, k_tg, k_w = jax.random.split(key, 3)
    inputs = jax.random.normal(k_in, (B, S_in, D_in), dtype=jnp.float32)
    targets = jax.random.normal(k_tg, (B, S_t, D_t), dtype=jnp.float32)
    # deterministic parameter init for the bilinear score weight
    w = (jax.random.normal(k_w, (D_t, D_in), dtype=jnp.float32)
         / jnp.sqrt(jnp.float32(D_t)))

    ctx, attn_w = attention_forward(inputs, targets, w)
    jax.block_until_ready((ctx, attn_w))
    assert ctx.shape == (B, S_t, D_in) and attn_w.shape == (B, S_t, S_in)

    # Tight check against a reference that follows the same precision policy
    # (isolates kernel bugs from the intentional bf16-operand choice).
    ctx_m, attn_m = _reference_matched(inputs, targets, w, jnp.bfloat16)
    assert jnp.allclose(ctx, ctx_m, atol=1e-2, rtol=1e-2)
    assert jnp.allclose(attn_w, attn_m, atol=1e-2, rtol=1e-2)

    # Loose sanity check against the f32 reference (bf16 MXU operands).
    ctx_ref, attn_ref = _reference(inputs, targets, w)
    assert jnp.allclose(ctx, ctx_ref, atol=1e-1, rtol=1e-1)
    assert jnp.allclose(attn_w, attn_ref, atol=1e-1, rtol=1e-1)

    # Rows normalize to 1 at f32 precision (exact divide in the kernel softmax).
    assert jnp.allclose(jnp.sum(attn_w, axis=-1), 1.0, atol=1e-5)

    print("KERNEL_OK")
</pallas_src>

<mosaic_0001>
module attributes {stable_mosaic.version = 11 : i64} {
  func.func @_attention_kernel(%arg0: i32, %arg1: i32, %arg2: memref<1x128x128xbf16, #tpu.memory_space<vmem>>, %arg3: memref<1x8x128xbf16, #tpu.memory_space<vmem>>, %arg4: memref<1x8x128xf32, #tpu.memory_space<vmem>>, %arg5: memref<1x8x128xf32, #tpu.memory_space<vmem>>) attributes {dimension_semantics = [#tpu.dimension_semantics<parallel>, #tpu.dimension_semantics<parallel>], iteration_bounds = array<i64: 2, 1>, scalar_prefetch = 0 : i64, scratch_operands = 0 : i64, tpu.core_type = #tpu.core_type<tc>, window_params = [{transform_indices = @transform_0, window_bounds = array<i64: 1, 128, 128>}, {transform_indices = @transform_1, window_bounds = array<i64: 1, 8, 128>}, {transform_indices = @transform_2, window_bounds = array<i64: 1, 8, 128>}, {transform_indices = @transform_3, window_bounds = array<i64: 1, 8, 128>}]} {
    %c0 = arith.constant 0 : index
    %c0_0 = arith.constant 0 : index
    %c0_1 = arith.constant 0 : index
    %0 = vector.load %arg2[%c0, %c0_0, %c0_1] : memref<1x128x128xbf16, #tpu.memory_space<vmem>>, vector<1x128x128xbf16>
    %1 = vector.shape_cast %0 : vector<1x128x128xbf16> to vector<128x128xbf16>
    %c0_2 = arith.constant 0 : index
    %c0_3 = arith.constant 0 : index
    %c0_4 = arith.constant 0 : index
    %2 = vector.load %arg3[%c0_2, %c0_3, %c0_4] : memref<1x8x128xbf16, #tpu.memory_space<vmem>>, vector<1x8x128xbf16>
    %3 = vector.shape_cast %2 : vector<1x8x128xbf16> to vector<8x128xbf16>
    %cst = arith.constant dense<0.000000e+00> : vector<8x128xf32>
    %4 = tpu.matmul %3, %1, %cst {dimension_numbers = #tpu.dot_dimension_numbers<[1], [1], [0], [0], [0, 0, 1, 0], [], []>} : vector<8x128xbf16>, vector<128x128xbf16>, vector<8x128xf32> -> vector<8x128xf32>
    %5 = tpu.iota {dimensions = array<i32: 1>} : vector<1x128xi32>
    %c8_i32 = arith.constant 8 : i32
    %6 = vector.broadcast %c8_i32 : i32 to vector<1x128xi32>
    %7 = arith.cmpi slt, %5, %6 : vector<1x128xi32>
    %cst_5 = arith.constant 0.000000e+00 : f32
    %cst_6 = arith.constant -1.000000e+30 : f32
    %8 = vector.broadcast %cst_5 : f32 to vector<1x128xf32>
    %9 = vector.broadcast %cst_6 : f32 to vector<1x128xf32>
    %10 = arith.select %7, %8, %9 : vector<1x128xi1>, vector<1x128xf32>
    %11 = vector.broadcast %10 : vector<1x128xf32> to vector<8x128xf32>
    %12 = arith.addf %4, %11 : vector<8x128xf32>
    %cst_7 = arith.constant dense<0xFF800000> : vector<8xf32>
    %13 = vector.multi_reduction <maximumf>, %12, %cst_7 [1] : vector<8x128xf32> to vector<8xf32>
    %14 = vector.shape_cast %13 : vector<8xf32> to vector<8x1xf32>
    %15 = vector.broadcast %14 : vector<8x1xf32> to vector<8x128xf32>
    %16 = arith.subf %12, %15 : vector<8x128xf32>
    %17 = math.exp %16 : vector<8x128xf32>
    %cst_8 = arith.constant dense<0.000000e+00> : vector<8xf32>
    %18 = vector.multi_reduction <add>, %17, %cst_8 [1] : vector<8x128xf32> to vector<8xf32>
    %19 = vector.shape_cast %18 : vector<8xf32> to vector<8x1xf32>
    %20 = vector.broadcast %19 : vector<8x1xf32> to vector<8x128xf32>
    %21 = arith.divf %17, %20 : vector<8x128xf32>
    %22 = arith.truncf %21 : vector<8x128xf32> to vector<8x128xbf16>
    %cst_9 = arith.constant dense<0.000000e+00> : vector<8x128xf32>
    %23 = tpu.matmul %22, %1, %cst_9 {dimension_numbers = #tpu.dot_dimension_numbers<[1], [0], [0], [1], [0, 0, 1, 1], [], []>} : vector<8x128xbf16>, vector<128x128xbf16>, vector<8x128xf32> -> vector<8x128xf32>
    %c0_10 = arith.constant 0 : index
    %c0_11 = arith.constant 0 : index
    %c0_12 = arith.constant 0 : index
    %24 = vector.load %arg4[%c0_10, %c0_11, %c0_12] : memref<1x8x128xf32, #tpu.memory_space<vmem>>, vector<1x8x128xf32>
    %25 = vector.shape_cast %24 : vector<1x8x128xf32> to vector<8x128xf32>
    %26 = vector.shape_cast %23 : vector<8x128xf32> to vector<1x8x128xf32>
    tpu.vector_store %arg4[%c0_10, %c0_11, %c0_12], %26 {strides = array<i32>} : memref<1x8x128xf32, #tpu.memory_space<vmem>>, vector<1x8x128xf32>,
    %c0_13 = arith.constant 0 : index
    %c0_14 = arith.constant 0 : index
    %c0_15 = arith.constant 0 : index
    %27 = vector.load %arg5[%c0_13, %c0_14, %c0_15] : memref<1x8x128xf32, #tpu.memory_space<vmem>>, vector<1x8x128xf32>
    %28 = vector.shape_cast %27 : vector<1x8x128xf32> to vector<8x128xf32>
    %29 = vector.shape_cast %21 : vector<8x128xf32> to vector<1x8x128xf32>
    tpu.vector_store %arg5[%c0_13, %c0_14, %c0_15], %29 {strides = array<i32>} : memref<1x8x128xf32, #tpu.memory_space<vmem>>, vector<1x8x128xf32>,
    return
  }
  func.func @transform_0(%arg0: i32, %arg1: i32) -> (i32, i32, i32) {
    %c0_i32 = arith.constant 0 : i32
    %c0_i32_0 = arith.constant 0 : i32
    %c0_i32_1 = arith.constant 0 : i32
    return %arg0, %c0_i32, %c0_i32_0 : i32, i32, i32
  }
  func.func @transform_1(%arg0: i32, %arg1: i32) -> (i32, i32, i32) {
    %c0_i32 = arith.constant 0 : i32
    %c0_i32_0 = arith.constant 0 : i32
    return %arg0, %arg1, %c0_i32 : i32, i32, i32
  }
  func.func @transform_2(%arg0: i32, %arg1: i32) -> (i32, i32, i32) {
    %c0_i32 = arith.constant 0 : i32
    %c0_i32_0 = arith.constant 0 : i32
    return %arg0, %arg1, %c0_i32 : i32, i32, i32
  }
  func.func @transform_3(%arg0: i32, %arg1: i32) -> (i32, i32, i32) {
    %c0_i32 = arith.constant 0 : i32
    %c0_i32_0 = arith.constant 0 : i32
    return %arg0, %arg1, %c0_i32 : i32, i32, i32
  }
}

</mosaic_0001>

<bundles_post_ra>
// kernel: tpu_custom_call.1
= control target key start
LH: loop header
LB: loop body
LE: loop exit
PB: predicated region body
PF: predicated region fallthrough
CT: control target
= control target key end

     0   :  { %9 = vsyncpa [#allocation3], 0  ;;  %s1054_s0 = inlined_call_operand.hbm [shape: bf16[2,128,128], index: 0, kind: input, shape index: {}]   ;;  %s1055_s1 = inlined_call_operand.hbm [shape: bf16[2,8,128], index: 1, kind: input, shape index: {}]   ;;  %s1056_s2 = inlined_call_operand.hbm [shape: f32[2,8,128], index: 2, kind: output, shape index: {0}]   ;;  %s1057_s3 = inlined_call_operand.hbm [shape: f32[2,8,128], index: 3, kind: output, shape index: {1}]  }
   0x1   :  { %11 = vsyncpa [#allocation3 + $0x1], 0 }
   0x2   :  { %12 = vsyncpa [#allocation6], 0 }
   0x3   :  { %14 = vsyncpa [#allocation6 + $0x1], 0 }
   0x4   :  { %15 = vsyncpa [#allocation4], 0 }
   0x5   :  { %17 = vsyncpa [#allocation4 + $0x1], 0 }
   0x6   :  { %18 = vsyncpa [#allocation9], 0 }
   0x7   :  { %20 = vsyncpa [#allocation9 + $0x1], 0  ;;  %s897_s12 = smov 0   ;;  %s899_s13 = smov 0  }
   0x8   :  { %s901_s14 = smov 0   ;;  %s903_s15 = smov 0  }
   0x9   :  { %s905_s16 = smov 0   ;;  %s907_s17 = smov 0  }
   0xa LB: > { %s554_s18 = sadd.s32 4294967295, %s872_s17   ;;  %s555_s19 = sadd.s32 4294967294, %s872_s17   ;;  %s872_s17 = sphi %s907_s17, %s26_s17   ;;  %s868_s16 = sphi %s905_s16, %s1067_s16   ;;  %s864_s15 = sphi %s903_s15, %s1066_s15   ;;  %s860_s14 = sphi %s901_s14, %s1065_s14   ;;  %s856_s13 = sphi %s899_s13, %s1064_s13   ;;  %s852_s12 = sphi %s897_s12, %s1063_s12  }
   0xb   : > { %s38_s20 = sadd.s32 1, %s868_s16  ;;  %s45_s21 = sadd.s32 1, %s860_s14 }
   0xc   : > { %p40_p0 = scmp.ge.s32.totalorder %s38_s20, 2  ;;  %p52_p1 = scmp.ne.s32.totalorder %s860_s14, %s856_s13 }
   0xd   : > { %p53_p2 = scmp.eq.s32.totalorder %s872_s17, 0  ;;  %p58_p3 = scmp.ne.s32.totalorder %s856_s13, %s852_s12 }
   0xe   : > { %s1069_s20 = smov (%p40_p0, %s38_s20), 0  ;;  %p59_p5 = scmp.eq.s32.totalorder %s554_s18, 0 }
   0xf   : > { %p938_p4 = por %p53_p2, %p52_p1  ;;  %s42_s23 = ssub.s32 %s868_s16, %s1069_s20 }
  0x10   : > { %p112_p6 = scmp.eq.s32.totalorder %s554_s18, 1  ;;  %p43_p7 = scmp.eq.s32.totalorder %s42_s23, 0 }
  0x11   : > { %p944_p8 = por %p59_p5, %p58_p3  ;;  %p118_p10 = scmp.eq.s32.totalorder %s555_s19, 1 }
  0x12   : > { %p948_p9 = por %p112_p6, %p52_p1  ;;  %p557_p12 = scmp.ge.s32.totalorder %s872_s17, 2 }
  0x13   : > { %s953_s26 = scalar_select %p43_p7, %s860_s14, %s45_s21  }
  0x14   : > { %p955_p11 = por %p118_p10, %p58_p3  ;;  %p637_p13 = scmp.lt.s32.totalorder %s872_s17, 2 }
  0x15   : > { %s166_s28 = sand.u32 1, %s860_s14   ;;  %s606_s30 = sshll.u32 %s868_s16, 6 }
  0x16   : > { %s558_s29 = sshll.u32 %s166_s28, 6  ;;  %s175_s6 = scalar_lea.hbm %s1054_s0, %s606_s30 }
  0x17   : > { %s170_s7 = scalar_lea.vmem [#allocation2], %s558_s29  ;;  %s176_s9 = sshll.u32 %s175_s6, 4  ;;  %s177_s9 = int_to_ptr.hbm [resolvable:$true] %s176_s9 }
  0x18   : > { %s178_s8 = sshll.u32 %s170_s7, 4  ;;  %p968_p0 = pnand %p637_p13, %p938_p4  ;;  %s179_s8 = int_to_ptr.vmem [resolvable:$true] %s178_s8 }
  0x19   : > { %p563_p1 = scmp.ge.s32.totalorder %s872_s17, 1  ;;  %s167_s11 = scalar_lea.sflag [#allocation3], %s166_s28 }
  0x1a   : > { %s874_s18 = smov 64   ;;  %s875_s19 = smov 4  }
  0x1b   : > { %626 = dma.hbm_to_vmem [thread:$0]  (!%p968_p0), %s177_s9, 1024, %s179_s8, %s167_s11, %s874_s18, %s874_s18, %s875_s19  }
  0x1c   : > { %p206_p2 = scmp.lt.s32.totalorder %s872_s17, 3  ;;  %s561_s21 = sshll.u32 %s166_s28, 2 }
  0x1d   : > { %s562_s23 = sshll.u32 %s868_s16, 2  ;;  %s192_s4 = scalar_lea.vmem [#allocation5], %s561_s21 }
  0x1e   : > { %p207_p3 = pnand %p563_p1, %p206_p2  ;;  %s197_s22 = scalar_lea.hbm %s1055_s1, %s562_s23 }
  0x1f   : > { %s201_s5 = sshll.u32 %s192_s4, 4  ;;  %s199_s6 = sshll.u32 %s197_s22, 4  ;;  %s202_s5 = int_to_ptr.vmem [resolvable:$true] %s201_s5  ;;  %s200_s6 = int_to_ptr.hbm [resolvable:$true] %s199_s6 }
  0x20   : > { %s189_s7 = scalar_lea.sflag [#allocation6], %s166_s28  ;;  %210 = sbr.rel (%p207_p3) target bundleno = 631 (0x277), region = 28 }
  0x21   : > { %629 = dma.hbm_to_vmem [thread:$0]  (!%p968_p0), %s200_s6, 64, %s202_s5, %s189_s7  }
  0x22   : > { %s983_s8 = sand.u32 (!%p207_p3), 1, %s856_s13  }
  0x23   : > { %s564_s9 = sshll.u32 (!%p207_p3), %s983_s8, 6  ;;  %s213_s11 = scalar_lea.sflag (!%p207_p3), [#allocation3], %s983_s8 }
  0x24   : > { %s216_s18 = scalar_lea.vmem (!%p207_p3), [#allocation2], %s564_s9 }
  0x25   : > { %835 = dma.done.wait (%p944_p8), %s213_s11, 1024  }
  0x26   : > { %837 = vsyncadd (%p944_p8), %s213_s11, 4294966272  ;;  %s565_s28 = sshll.u32 %s983_s8, 2  ;;  %s223_s10 = scalar_lea.sflag [#allocation6], %s983_s8 }
  0x27   : > { %s226_s19 = scalar_lea.vmem [#allocation5], %s565_s28 }
  0x28   : > { %839 = dma.done.wait (%p944_p8), %s223_s10, 64  }
  0x29   : > { %841 = vsyncadd (%p944_p8), %s223_s10, 4294967232  ;;  %v614_v0 = vld [vmem:[%s216_s18 + $0x38] sm:$0xff]  ;;  %v613_v1 = vld [vmem:[%s216_s18 + $0x30] sm:$0xff]  ;;  %v277_v9 = vlaneseq  ;;  %v876_v11 = vmov -1e+30   ;;  %s566_s24 = sshll.u32 %s983_s8, 3 }
  0x2a   : > { %329 = vmatpush.bf16.xpose.msra.mxu0 %v614_v0  ;;  %365 = vmatpush.bf16.msra.mxu1 %v614_v0  ;;  %v612_v2 = vld [vmem:[%s216_s18 + $0x28] sm:$0xff]  ;;  %v611_v3 = vld [vmem:[%s216_s18 + $0x20] sm:$0xff]  ;;  %v610_v4 = vld [vmem:[%s216_s18 + $0x18] sm:$0xff]  ;;  %s259_s21 = scalar_lea.vmem [#allocation8], %s566_s24  ;;  %s602_s23 = sshll.u32 %s864_s15, 3 }
  0x2b   : > { %v609_v5 = vld [vmem:[%s216_s18 + $0x10] sm:$0xff]  ;;  %v608_v6 = vld [vmem:[%s216_s18 + $0x8] sm:$0xff]  ;;  %v607_v7 = vld [vmem:[%s216_s18] sm:$0xff]  ;;  %v278_v10 = vand.u32 127, %v277_v9  ;;  %s412_s22 = scalar_lea.hbm %s1057_s3, %s602_s23  ;;  %s414_s4 = sshll.u32 %s259_s21, 4  ;;  %s415_s4 = int_to_ptr.vmem [resolvable:$true] %s414_s4 }
  0x2c   : > { %v276_v8 = vld [vmem:[%s226_s19] sm:$0xf]  ;;  %s416_s5 = sshll.u32 %s412_s22, 4  ;;  %s386_s6 = scalar_lea.sflag [#allocation9], %s983_s8  ;;  %s417_s5 = int_to_ptr.hbm [resolvable:$true] %s416_s5 }
  0x2d   : > { %vm279_vm0 = vcmp.lt.s32.totalorder %v278_v10, 8  ;;  %s768_s7 = sshra.s32 %s417_s5, 4  ;;  %s774_s15 = scalar_lea.hbm %s1057_s3, 16  ;;  %s769_s7 = int_to_ptr.hbm [resolvable:$true] %s768_s7 }
  0x2e   : > { %366 = vmatpush.bf16.msra.mxu1 %v613_v1  ;;  %v280_v12 = vsel %vm279_vm0, 0.0, %v876_v11  ;;  %s770_s9 = scalar_lea.hbm %s769_s7, 8  ;;  %p775_p7 = scmp.lt.s32.totalorder %s769_s7, %s1057_s3 }
  0x2f   : > { %p771_p4 = scmp.ne.s32.totalorder %s769_s7, %s770_s9  ;;  %p776_p8 = scmp.lt.s32.totalorder %s774_s15, %s770_s9 }
  0x31   : > { %p772_p5 = pnand %p771_p4, %p948_p9  ;;  %p777_p10 = por %p776_p8, %p775_p7 }
  0x32   : > { %330 = vmatpush.bf16.xpose.msra.mxu0 %v613_v1  ;;  %367 = vmatpush.bf16.msra.mxu1 %v612_v2 }
  0x33   : > { %p773_p6 = pneg %p772_p5 }
  0x35   : > { %p778_p13 = pnand %p777_p10, %p773_p6 }
  0x36   : > { %368 = vmatpush.bf16.msra.mxu1 %v611_v3 }
  0x3a   : > { %331 = vmatpush.bf16.xpose.msra.mxu0 %v612_v2  ;;  %369 = vmatpush.bf16.msra.mxu1 %v610_v4 }
  0x3e   : > { %370 = vmatpush.bf16.msra.mxu1 %v609_v5 }
  0x42   : > { %332 = vmatpush.bf16.xpose.msra.mxu0 %v611_v3  ;;  %371 = vmatpush.bf16.msra.mxu1 %v608_v6 }
  0x46   : > { %372 = vmatpush.bf16.msra.mxu1 %v607_v7 }
  0x4a   : > { %333 = vmatpush.bf16.xpose.msra.mxu0 %v610_v4 }
  0x52   : > { %334 = vmatpush.bf16.xpose.msra.mxu0 %v609_v5 }
  0x5a   : > { %335 = vmatpush.bf16.xpose.msra.mxu0 %v608_v6 }
  0x62   : > { %336 = vmatpush.bf16.xpose.msra.mxu0 %v607_v7 }
  0x69   : > { %337 = vmatmul.bf16.vlgmr.msra.gmra.mxu0 %v276_v8 }
  0xe6   : > { %v338_v13 = vpop.f32.mrf.mxu0 }
  0xe7   : > { %v339_v14 = vadd.f32 %v338_v13, %v280_v12 }
  0xe9   : > { %342 = vmax.xlane.f32.xlu0 %v339_v14 }
  0xee   : > { %v340_v15 = vpop.f32.mrf.mxu0 }
 0x15c   : > { %v343_v16 = vpop.xlane.xlu0 %342 }
 0x15d   : > { %v344_v17 = vsub.f32 %v339_v14, %v343_v16 }
 0x15f   : > { %v345_v18 = vmul.f32 1.442695, %v344_v17 }
 0x161   : > { %690 = vpow2.f32 %v345_v18 }
 0x167   : > { %v691_v19 = vpop.eup %690 }
 0x168   : > { %347 = vadd.xlane.f32.xlu0 %v691_v19 }
 0x1db   : > { %v348_v20 = vpop.xlane.xlu0 %347 }
 0x1dc   : > { %692 = vrcp.f32 %v348_v20  ;;  %v360_v24 = vand.u32 2147483648, %v348_v20  ;;  %v358_v26 = vand.u32 2147483647, %v348_v20  ;;  %vm354_vm2 = vweird.f32 %v348_v20 }
 0x1de   : > { %v361_v28 = vor.u32 1.1754944e-38, %v360_v24  ;;  %vm359_vm4 = vcmp.eq.f32.partialorder %v358_v26, 8.507059e+37 }
 0x1e2   : > { %v693_v21 = vpop.eup %692 }
 0x1e3   : > { %v350_v22 = vmul.f32 %v693_v21, %v348_v20  ;;  %vm355_vm1 = vweird.f32 %v693_v21 }
 0x1e4   : > { %vm356_vm3 = vmor %vm354_vm2, %vm355_vm1 }
 0x1e5   : > { %v351_v23 = vsub.f32 1.0, %v350_v22 }
 0x1e7   : > { %v352_v25 = vmul.f32 %v693_v21, %v351_v23 }
 0x1e9   : > { %v353_v27 = vadd.f32 %v693_v21, %v352_v25 }
 0x1eb   : > { %v357_v29 = vsel %vm356_vm3, %v693_v21, %v353_v27 }
 0x1ec   : > { %v362_v30 = vsel %vm359_vm4, %v361_v28, %v357_v29 }
 0x1ed   : > { %v363_v31 = vmul.f32 %v691_v19, %v362_v30 }
 0x1ef   : > { %v364_v32 = vpack.c.bf16 %v363_v31, %v363_v31  ;;  %379 = vst [vmem:[%s259_s21] sm:$0xff] %v363_v31 }
 0x1f1   : > { %373 = vmatmul.bf16.vlgmr.msra.gmra.mxu1 %v364_v32 }
 0x1f2   : > { %781 = shalt.err (!%p778_p13)
}
 0x1f3   : > { %620 = dma.vmem_to_hbm [thread:$0]  (%p948_p9), %s415_s4, 128, %s417_s5, %s386_s6  }
 0x1f4   : > { %s397_s29 = scalar_lea.hbm %s1056_s2, %s602_s23  ;;  %s252_s30 = scalar_lea.vmem [#allocation7], %s566_s24 }
 0x1f5   : > { %s399_s22 = sshll.u32 %s252_s30, 4  ;;  %s401_s11 = sshll.u32 %s397_s29, 4  ;;  %s400_s22 = int_to_ptr.vmem [resolvable:$true] %s399_s22  ;;  %s402_s11 = int_to_ptr.hbm [resolvable:$true] %s401_s11 }
 0x1f6   : > { %s381_s7 = scalar_lea.sflag [#allocation4], %s983_s8  ;;  %s796_s9 = sshra.s32 %s402_s11, 4  ;;  %s797_s9 = int_to_ptr.hbm [resolvable:$true] %s796_s9 }
 0x1f7   : > { %s798_s18 = scalar_lea.hbm %s797_s9, 8  ;;  %s802_s23 = scalar_lea.hbm %s1056_s2, 16 }
 0x1f8   : > { %p799_p0 = scmp.ne.s32.totalorder %s797_s9, %s798_s18  ;;  %p803_p3 = scmp.lt.s32.totalorder %s797_s9, %s1056_s2 }
 0x1f9   : > { %p804_p4 = scmp.lt.s32.totalorder %s802_s23, %s798_s18 }
 0x1fa   : > { %p800_p1 = pnand %p799_p0, %p948_p9 }
 0x1fb   : > { %p805_p5 = por %p804_p4, %p803_p3 }
 0x1fc   : > { %p801_p2 = pneg %p800_p1 }
 0x1fe   : > { %p806_p6 = pnand %p805_p5, %p801_p2 }
 0x26e   : > { %v374_v33 = vpop.f32.mrf.mxu1 }
 0x26f   : > { %378 = vst [vmem:[%s252_s30] sm:$0xff] %v374_v33 }
 0x270   : > { %809 = shalt.err (!%p806_p6)
}
 0x271   : > { %619 = dma.vmem_to_hbm [thread:$0]  (%p948_p9), %s400_s22, 128, %s402_s11, %s381_s7  }
 0x276   : > { %v376_v34 = vpop.f32.mrf.mxu1 }
 0x277 PF: > { %s428_s8 = sand.u32 1, %s852_s12   ;;  %p631_p7 = pnand %p557_p12, %p955_p11 }
 0x278   : > { %s429_s15 = scalar_lea.sflag [#allocation4], %s428_s8 }
 0x279   : > { %p632_p8 = pneg %p631_p7 }
 0x27b   : > { %843 = dma.done.wait (%p632_p8), %s429_s15, 128  }
 0x27c   : > { %845 = vsyncadd (%p632_p8), %s429_s15, 4294967168  ;;  %s439_s28 = scalar_lea.sflag [#allocation9], %s428_s8 }
 0x27d   : > { %847 = dma.done.wait (%p632_p8), %s439_s28, 128  }
 0x27e   : > { %849 = vsyncadd (%p632_p8), %s439_s28, 4294967168  ;;  %s26_s17 = sadd.s32 1, %s872_s17   ;;  %s1063_s12 = smov %s856_s13 }
 0x27f   : > { %p23_p10 = scmp.ge.s32.totalorder %s26_s17, 4   ;;  %s1064_s13 = smov %s860_s14 }
 0x280   : > { %s1065_s14 = smov %s953_s26  ;;  %s1066_s15 = smov %s868_s16 }
 0x281   : > { %s1067_s16 = smov %s1069_s20  ;;  %25 = sbr.rel (!%p23_p10) target bundleno = 10 (0xa), region = 103 }
 0x286   :  { %445 = vsyncpa [#allocation3], 1 }
 0x287   :  { %447 = vsyncpa [#allocation3 + $0x1], 1 }
 0x288   :  { %448 = vsyncpa [#allocation6], 1 }
 0x289   :  { %450 = vsyncpa [#allocation6 + $0x1], 1 }
 0x28a   :  { %451 = vsyncpa [#allocation4], 1 }
 0x28b   :  { %453 = vsyncpa [#allocation4 + $0x1], 1 }
 0x28c   :  { %454 = vsyncpa [#allocation9], 1 }
 0x28d   :  { %456 = vsyncpa [#allocation9 + $0x1], 1 }

</bundles_post_ra>
